<compile_context>
chip_gen: v6e
topology: v6e:2x2x1
jax: 0.10.0
libtpu: 0.0.40
codegen_flags: <defaults>
</compile_context>

<pallas_src>
import jax
import jax.numpy as jnp
from jax.experimental import pallas as pl
from jax.experimental.pallas import tpu as pltpu


def critic_kernel(
    # batch-tiled inputs
    obs_ref, act_ref,
    # trunk params (VMEM-resident across the grid)
    wt_ref, bt_ref, g_ref, beta_ref,
    # fused Q-head params
    w1h_ref, w1a_ref, b1_ref,   # layer 1: (F, 2H), (A, 2H), (1, 2H)
    w2_ref, b2_ref,             # layer 2: block-diag (2H, 2H), (1, 2H)
    w3_ref, b3_ref,             # layer 3: block-diag (2H, 2),  (1, 2)
    # output
    q_ref,                      # (TB, 2)  -> [:, 0] = q1, [:, 1] = q2
):
    f32 = jnp.float32

    # ---- trunk: Linear -> LayerNorm -> Tanh -------------------------------
    h = jnp.dot(obs_ref[...], wt_ref[...], preferred_element_type=f32) + bt_ref[...]
    mu = jnp.mean(h, axis=-1, keepdims=True)
    d = h - mu
    var = jnp.mean(d * d, axis=-1, keepdims=True)
    h = d * jax.lax.rsqrt(var + 1e-5)
    h = jnp.tanh(h * g_ref[...] + beta_ref[...])

    # ---- fused Q1/Q2 MLP: concat([h, action]) via split matmul ------------
    x = (jnp.dot(h, w1h_ref[...], preferred_element_type=f32)
         + jnp.dot(act_ref[...], w1a_ref[...], preferred_element_type=f32)
         + b1_ref[...])
    x = jnp.maximum(x, 0.0)
    x = jnp.dot(x, w2_ref[...], preferred_element_type=f32) + b2_ref[...]
    x = jnp.maximum(x, 0.0)
    q_ref[...] = jnp.dot(x, w3_ref[...], preferred_element_type=f32) + b3_ref[...]


def _round_up(x, m):
    return (x + m - 1) // m * m


def critic_forward(obs, action, params, *, block_b=256):
    """obs: [B, repr_dim], action: [B, action_dim] -> (q1 [B,1], q2 [B,1])."""
    B, repr_dim = obs.shape
    action_dim = action.shape[1]
    feature_dim = params["trunk_w"].shape[1]
    hidden_dim = params["q1_w2"].shape[0]
    H2 = 2 * hidden_dim

    # ---- pack / fuse Q-head weights on the XLA side (free under jit) ------
    w1h = jnp.concatenate(
        [params["q1_w1"][:feature_dim], params["q2_w1"][:feature_dim]], axis=1)   # (F, 2H)
    w1a = jnp.concatenate(
        [params["q1_w1"][feature_dim:], params["q2_w1"][feature_dim:]], axis=1)   # (A, 2H)
    b1 = jnp.concatenate([params["q1_b1"], params["q2_b1"]], axis=1)              # (1, 2H)

    zH = jnp.zeros((hidden_dim, hidden_dim), jnp.float32)
    w2 = jnp.concatenate([
        jnp.concatenate([params["q1_w2"], zH], axis=1),
        jnp.concatenate([zH, params["q2_w2"]], axis=1),
    ], axis=0)                                                                     # (2H, 2H)
    b2 = jnp.concatenate([params["q1_b2"], params["q2_b2"]], axis=1)               # (1, 2H)

    z1 = jnp.zeros((hidden_dim, 1), jnp.float32)
    w3 = jnp.concatenate([
        jnp.concatenate([params["q1_w3"], z1], axis=1),
        jnp.concatenate([z1, params["q2_w3"]], axis=1),
    ], axis=0)                                                                     # (2H, 2)
    b3 = jnp.concatenate([params["q1_b3"], params["q2_b3"]], axis=1)               # (1, 2)

    # ---- batch tiling ------------------------------------------------------
    tb = min(block_b, _round_up(B, 8))       # sublane-aligned batch tile
    Bp = _round_up(B, tb)
    if Bp != B:
        obs = jnp.pad(obs, ((0, Bp - B), (0, 0)))
        action = jnp.pad(action, ((0, Bp - B), (0, 0)))
    grid = (Bp // tb,)

    def row_spec(d):        # batch-tiled activations
        return pl.BlockSpec((tb, d), lambda i: (i, 0))

    def resident(arr):      # whole weight/bias, same block every grid step
        return pl.BlockSpec(arr.shape, lambda i: (0, 0))

    weights = (params["trunk_w"], params["trunk_b"], params["ln_g"], params["ln_b"],
               w1h, w1a, b1, w2, b2, w3, b3)

    q = pl.pallas_call(
        critic_kernel,
        grid=grid,
        out_shape=jax.ShapeDtypeStruct((Bp, 2), jnp.float32),
        in_specs=[row_spec(repr_dim), row_spec(action_dim)]
                 + [resident(w) for w in weights],
        out_specs=pl.BlockSpec((tb, 2), lambda i: (i, 0)),
        compiler_params=pltpu.CompilerParams(
            dimension_semantics=("parallel",)),
    )(obs, action, *weights)

    return q[:B, 0:1], q[:B, 1:2]


def init_params(key, repr_dim, action_dim, feature_dim, hidden_dim):
    """Deterministic synthetic init (shapes match the PyTorch module)."""
    ks = jax.random.split(key, 16)

    def lin(kw, kb, fan_in, fan_out, scale=0.1):
        w = scale * jax.random.normal(kw, (fan_in, fan_out), jnp.float32)
        b = scale * jax.random.normal(kb, (1, fan_out), jnp.float32)
        return w, b

    p = {}
    p["trunk_w"], p["trunk_b"] = lin(ks[0], ks[1], repr_dim, feature_dim)
    p["ln_g"] = jnp.ones((1, feature_dim), jnp.float32)
    p["ln_b"] = jnp.zeros((1, feature_dim), jnp.float32)

    in_dim = feature_dim + action_dim
    p["q1_w1"], p["q1_b1"] = lin(ks[2], ks[3], in_dim, hidden_dim)
    p["q1_w2"], p["q1_b2"] = lin(ks[4], ks[5], hidden_dim, hidden_dim)
    p["q1_w3"], p["q1_b3"] = lin(ks[6], ks[7], hidden_dim, 1)

    p["q2_w1"], p["q2_b1"] = lin(ks[8], ks[9], in_dim, hidden_dim)
    p["q2_w2"], p["q2_b2"] = lin(ks[10], ks[11], hidden_dim, hidden_dim)
    p["q2_w3"], p["q2_b3"] = lin(ks[12], ks[13], hidden_dim, 1)
    return p


def critic_ref(obs, action, p):
    """Pure-JAX reference for correctness checking."""
    h = obs @ p["trunk_w"] + p["trunk_b"]
    mu = jnp.mean(h, axis=-1, keepdims=True)
    var = jnp.mean((h - mu) ** 2, axis=-1, keepdims=True)
    h = (h - mu) * jax.lax.rsqrt(var + 1e-5) * p["ln_g"] + p["ln_b"]
    h = jnp.tanh(h)
    ha = jnp.concatenate([h, action], axis=-1)

    def head(prefix):
        x = jnp.maximum(ha @ p[f"{prefix}_w1"] + p[f"{prefix}_b1"], 0.0)
        x = jnp.maximum(x @ p[f"{prefix}_w2"] + p[f"{prefix}_b2"], 0.0)
        return x @ p[f"{prefix}_w3"] + p[f"{prefix}_b3"]

    return head("q1"), head("q2")


if __name__ == "__main__":
    # Small shapes consistent with the module's forward.
    B, REPR_DIM, ACTION_DIM, FEATURE_DIM, HIDDEN_DIM = 8, 64, 4, 32, 32

    key = jax.random.PRNGKey(0)
    k_obs, k_act, k_par = jax.random.split(key, 3)

    obs = jax.random.normal(k_obs, (B, REPR_DIM), jnp.float32)
    action = jax.random.uniform(k_act, (B, ACTION_DIM), jnp.float32,
                                minval=-1.0, maxval=1.0)
    params = init_params(k_par, REPR_DIM, ACTION_DIM, FEATURE_DIM, HIDDEN_DIM)

    q1, q2 = critic_forward(obs, action, params)
    jax.block_until_ready((q1, q2))

    q1_ref, q2_ref = critic_ref(obs, action, params)
    assert q1.shape == (B, 1) and q2.shape == (B, 1)
    assert jnp.allclose(q1, q1_ref, atol=1e-5, rtol=1e-5)
    assert jnp.allclose(q2, q2_ref, atol=1e-5, rtol=1e-5)

    print("KERNEL_OK")
</pallas_src>

<mosaic_0001>
module attributes {stable_mosaic.version = 11 : i64} {
  func.func @critic_kernel(%arg0: i32, %arg1: memref<8x64xf32, #tpu.memory_space<vmem>>, %arg2: memref<8x4xf32, #tpu.memory_space<vmem>>, %arg3: memref<64x32xf32, #tpu.memory_space<vmem>>, %arg4: memref<1x32xf32, #tpu.memory_space<vmem>>, %arg5: memref<1x32xf32, #tpu.memory_space<vmem>>, %arg6: memref<1x32xf32, #tpu.memory_space<vmem>>, %arg7: memref<32x64xf32, #tpu.memory_space<vmem>>, %arg8: memref<4x64xf32, #tpu.memory_space<vmem>>, %arg9: memref<1x64xf32, #tpu.memory_space<vmem>>, %arg10: memref<64x64xf32, #tpu.memory_space<vmem>>, %arg11: memref<1x64xf32, #tpu.memory_space<vmem>>, %arg12: memref<64x2xf32, #tpu.memory_space<vmem>>, %arg13: memref<1x2xf32, #tpu.memory_space<vmem>>, %arg14: memref<8x2xf32, #tpu.memory_space<vmem>>) attributes {dimension_semantics = [#tpu.dimension_semantics<parallel>], iteration_bounds = array<i64: 1>, scalar_prefetch = 0 : i64, scratch_operands = 0 : i64, tpu.core_type = #tpu.core_type<tc>, window_params = [{transform_indices = @transform_0, window_bounds = array<i64: 8, 64>}, {transform_indices = @transform_1, window_bounds = array<i64: 8, 4>}, {pipeline_mode = #tpu.pipeline_mode<synchronous>, transform_indices = @transform_2, window_bounds = array<i64: 64, 32>}, {pipeline_mode = #tpu.pipeline_mode<synchronous>, transform_indices = @transform_3, window_bounds = array<i64: 1, 32>}, {pipeline_mode = #tpu.pipeline_mode<synchronous>, transform_indices = @transform_4, window_bounds = array<i64: 1, 32>}, {pipeline_mode = #tpu.pipeline_mode<synchronous>, transform_indices = @transform_5, window_bounds = array<i64: 1, 32>}, {pipeline_mode = #tpu.pipeline_mode<synchronous>, transform_indices = @transform_6, window_bounds = array<i64: 32, 64>}, {pipeline_mode = #tpu.pipeline_mode<synchronous>, transform_indices = @transform_7, window_bounds = array<i64: 4, 64>}, {pipeline_mode = #tpu.pipeline_mode<synchronous>, transform_indices = @transform_8, window_bounds = array<i64: 1, 64>}, {pipeline_mode = #tpu.pipeline_mode<synchronous>, transform_indices = @transform_9, window_bounds = array<i64: 64, 64>}, {pipeline_mode = #tpu.pipeline_mode<synchronous>, transform_indices = @transform_10, window_bounds = array<i64: 1, 64>}, {pipeline_mode = #tpu.pipeline_mode<synchronous>, transform_indices = @transform_11, window_bounds = array<i64: 64, 2>}, {pipeline_mode = #tpu.pipeline_mode<synchronous>, transform_indices = @transform_12, window_bounds = array<i64: 1, 2>}, {transform_indices = @transform_13, window_bounds = array<i64: 8, 2>}]} {
    %c0 = arith.constant 0 : index
    %c0_0 = arith.constant 0 : index
    %0 = vector.load %arg1[%c0, %c0_0] : memref<8x64xf32, #tpu.memory_space<vmem>>, vector<8x64xf32>
    %c0_1 = arith.constant 0 : index
    %c0_2 = arith.constant 0 : index
    %1 = vector.load %arg3[%c0_1, %c0_2] : memref<64x32xf32, #tpu.memory_space<vmem>>, vector<64x32xf32>
    %cst = arith.constant dense<0.000000e+00> : vector<8x32xf32>
    %2 = tpu.matmul %0, %1, %cst {dimension_numbers = #tpu.dot_dimension_numbers<[1], [0], [0], [1], [0, 0, 1, 1], [], []>} : vector<8x64xf32>, vector<64x32xf32>, vector<8x32xf32> -> vector<8x32xf32>
    %c0_3 = arith.constant 0 : index
    %c0_4 = arith.constant 0 : index
    %3 = vector.load %arg4[%c0_3, %c0_4] : memref<1x32xf32, #tpu.memory_space<vmem>>, vector<1x32xf32>
    %4 = vector.broadcast %3 : vector<1x32xf32> to vector<8x32xf32>
    %5 = arith.addf %2, %4 : vector<8x32xf32>
    %cst_5 = arith.constant dense<0.000000e+00> : vector<8xf32>
    %6 = vector.multi_reduction <add>, %5, %cst_5 [1] : vector<8x32xf32> to vector<8xf32>
    %7 = vector.shape_cast %6 : vector<8xf32> to vector<8x1xf32>
    %cst_6 = arith.constant 3.200000e+01 : f32
    %8 = vector.broadcast %cst_6 : f32 to vector<8x1xf32>
    %9 = arith.divf %7, %8 : vector<8x1xf32>
    %10 = vector.broadcast %9 : vector<8x1xf32> to vector<8x32xf32>
    %11 = arith.subf %5, %10 : vector<8x32xf32>
    %12 = arith.mulf %11, %11 : vector<8x32xf32>
    %cst_7 = arith.constant dense<0.000000e+00> : vector<8xf32>
    %13 = vector.multi_reduction <add>, %12, %cst_7 [1] : vector<8x32xf32> to vector<8xf32>
    %14 = vector.shape_cast %13 : vector<8xf32> to vector<8x1xf32>
    %cst_8 = arith.constant 3.200000e+01 : f32
    %15 = vector.broadcast %cst_8 : f32 to vector<8x1xf32>
    %16 = arith.divf %14, %15 : vector<8x1xf32>
    %cst_9 = arith.constant 9.99999974E-6 : f32
    %17 = vector.broadcast %cst_9 : f32 to vector<8x1xf32>
    %18 = arith.addf %16, %17 : vector<8x1xf32>
    %19 = math.rsqrt %18 : vector<8x1xf32>
    %20 = vector.broadcast %19 : vector<8x1xf32> to vector<8x32xf32>
    %21 = arith.mulf %11, %20 : vector<8x32xf32>
    %c0_10 = arith.constant 0 : index
    %c0_11 = arith.constant 0 : index
    %22 = vector.load %arg5[%c0_10, %c0_11] : memref<1x32xf32, #tpu.memory_space<vmem>>, vector<1x32xf32>
    %23 = vector.broadcast %22 : vector<1x32xf32> to vector<8x32xf32>
    %24 = arith.mulf %21, %23 : vector<8x32xf32>
    %c0_12 = arith.constant 0 : index
    %c0_13 = arith.constant 0 : index
    %25 = vector.load %arg6[%c0_12, %c0_13] : memref<1x32xf32, #tpu.memory_space<vmem>>, vector<1x32xf32>
    %26 = vector.broadcast %25 : vector<1x32xf32> to vector<8x32xf32>
    %27 = arith.addf %24, %26 : vector<8x32xf32>
    %28 = math.tanh %27 : vector<8x32xf32>
    %c0_14 = arith.constant 0 : index
    %c0_15 = arith.constant 0 : index
    %29 = vector.load %arg7[%c0_14, %c0_15] : memref<32x64xf32, #tpu.memory_space<vmem>>, vector<32x64xf32>
    %cst_16 = arith.constant dense<0.000000e+00> : vector<8x64xf32>
    %30 = tpu.matmul %28, %29, %cst_16 {dimension_numbers = #tpu.dot_dimension_numbers<[1], [0], [0], [1], [0, 0, 1, 1], [], []>} : vector<8x32xf32>, vector<32x64xf32>, vector<8x64xf32> -> vector<8x64xf32>
    %c0_17 = arith.constant 0 : index
    %c0_18 = arith.constant 0 : index
    %31 = vector.load %arg2[%c0_17, %c0_18] : memref<8x4xf32, #tpu.memory_space<vmem>>, vector<8x4xf32>
    %c0_19 = arith.constant 0 : index
    %c0_20 = arith.constant 0 : index
    %32 = vector.load %arg8[%c0_19, %c0_20] : memref<4x64xf32, #tpu.memory_space<vmem>>, vector<4x64xf32>
    %cst_21 = arith.constant dense<0.000000e+00> : vector<8x64xf32>
    %33 = tpu.matmul %31, %32, %cst_21 {dimension_numbers = #tpu.dot_dimension_numbers<[1], [0], [0], [1], [0, 0, 1, 1], [], []>} : vector<8x4xf32>, vector<4x64xf32>, vector<8x64xf32> -> vector<8x64xf32>
    %34 = arith.addf %30, %33 : vector<8x64xf32>
    %c0_22 = arith.constant 0 : index
    %c0_23 = arith.constant 0 : index
    %35 = vector.load %arg9[%c0_22, %c0_23] : memref<1x64xf32, #tpu.memory_space<vmem>>, vector<1x64xf32>
    %36 = vector.broadcast %35 : vector<1x64xf32> to vector<8x64xf32>
    %37 = arith.addf %34, %36 : vector<8x64xf32>
    %cst_24 = arith.constant 0.000000e+00 : f32
    %38 = vector.broadcast %cst_24 : f32 to vector<8x64xf32>
    %39 = arith.maximumf %37, %38 : vector<8x64xf32>
    %c0_25 = arith.constant 0 : index
    %c0_26 = arith.constant 0 : index
    %40 = vector.load %arg10[%c0_25, %c0_26] : memref<64x64xf32, #tpu.memory_space<vmem>>, vector<64x64xf32>
    %cst_27 = arith.constant dense<0.000000e+00> : vector<8x64xf32>
    %41 = tpu.matmul %39, %40, %cst_27 {dimension_numbers = #tpu.dot_dimension_numbers<[1], [0], [0], [1], [0, 0, 1, 1], [], []>} : vector<8x64xf32>, vector<64x64xf32>, vector<8x64xf32> -> vector<8x64xf32>
    %c0_28 = arith.constant 0 : index
    %c0_29 = arith.constant 0 : index
    %42 = vector.load %arg11[%c0_28, %c0_29] : memref<1x64xf32, #tpu.memory_space<vmem>>, vector<1x64xf32>
    %43 = vector.broadcast %42 : vector<1x64xf32> to vector<8x64xf32>
    %44 = arith.addf %41, %43 : vector<8x64xf32>
    %cst_30 = arith.constant 0.000000e+00 : f32
    %45 = vector.broadcast %cst_30 : f32 to vector<8x64xf32>
    %46 = arith.maximumf %44, %45 : vector<8x64xf32>
    %c0_31 = arith.constant 0 : index
    %c0_32 = arith.constant 0 : index
    %47 = vector.load %arg12[%c0_31, %c0_32] : memref<64x2xf32, #tpu.memory_space<vmem>>, vector<64x2xf32>
    %cst_33 = arith.constant dense<0.000000e+00> : vector<8x2xf32>
    %48 = tpu.matmul %46, %47, %cst_33 {dimension_numbers = #tpu.dot_dimension_numbers<[1], [0], [0], [1], [0, 0, 1, 1], [], []>} : vector<8x64xf32>, vector<64x2xf32>, vector<8x2xf32> -> vector<8x2xf32>
    %c0_34 = arith.constant 0 : index
    %c0_35 = arith.constant 0 : index
    %49 = vector.load %arg13[%c0_34, %c0_35] : memref<1x2xf32, #tpu.memory_space<vmem>>, vector<1x2xf32>
    %50 = vector.broadcast %49 : vector<1x2xf32> to vector<8x2xf32>
    %51 = arith.addf %48, %50 : vector<8x2xf32>
    %c0_36 = arith.constant 0 : index
    %c0_37 = arith.constant 0 : index
    %52 = vector.load %arg14[%c0_36, %c0_37] : memref<8x2xf32, #tpu.memory_space<vmem>>, vector<8x2xf32>
    tpu.vector_store %arg14[%c0_36, %c0_37], %51 {strides = array<i32>} : memref<8x2xf32, #tpu.memory_space<vmem>>, vector<8x2xf32>,
    return
  }
  func.func @transform_0(%arg0: i32) -> (i32, i32) {
    %c0_i32 = arith.constant 0 : i32
    %c0_i32_0 = arith.constant 0 : i32
    return %arg0, %c0_i32 : i32, i32
  }
  func.func @transform_1(%arg0: i32) -> (i32, i32) {
    %c0_i32 = arith.constant 0 : i32
    %c0_i32_0 = arith.constant 0 : i32
    return %arg0, %c0_i32 : i32, i32
  }
  func.func @transform_2(%arg0: i32) -> (i32, i32) {
    %c0_i32 = arith.constant 0 : i32
    %c0_i32_0 = arith.constant 0 : i32
    %c0_i32_1 = arith.constant 0 : i32
    return %c0_i32, %c0_i32_0 : i32, i32
  }
  func.func @transform_3(%arg0: i32) -> (i32, i32) {
    %c0_i32 = arith.constant 0 : i32
    %c0_i32_0 = arith.constant 0 : i32
    %c0_i32_1 = arith.constant 0 : i32
    return %c0_i32, %c0_i32_0 : i32, i32
  }
  func.func @transform_4(%arg0: i32) -> (i32, i32) {
    %c0_i32 = arith.constant 0 : i32
    %c0_i32_0 = arith.constant 0 : i32
    %c0_i32_1 = arith.constant 0 : i32
    return %c0_i32, %c0_i32_0 : i32, i32
  }
  func.func @transform_5(%arg0: i32) -> (i32, i32) {
    %c0_i32 = arith.constant 0 : i32
    %c0_i32_0 = arith.constant 0 : i32
    %c0_i32_1 = arith.constant 0 : i32
    return %c0_i32, %c0_i32_0 : i32, i32
  }
  func.func @transform_6(%arg0: i32) -> (i32, i32) {
    %c0_i32 = arith.constant 0 : i32
    %c0_i32_0 = arith.constant 0 : i32
    %c0_i32_1 = arith.constant 0 : i32
    return %c0_i32, %c0_i32_0 : i32, i32
  }
  func.func @transform_7(%arg0: i32) -> (i32, i32) {
    %c0_i32 = arith.constant 0 : i32
    %c0_i32_0 = arith.constant 0 : i32
    %c0_i32_1 = arith.constant 0 : i32
    return %c0_i32, %c0_i32_0 : i32, i32
  }
  func.func @transform_8(%arg0: i32) -> (i32, i32) {
    %c0_i32 = arith.constant 0 : i32
    %c0_i32_0 = arith.constant 0 : i32
    %c0_i32_1 = arith.constant 0 : i32
    return %c0_i32, %c0_i32_0 : i32, i32
  }
  func.func @transform_9(%arg0: i32) -> (i32, i32) {
    %c0_i32 = arith.constant 0 : i32
    %c0_i32_0 = arith.constant 0 : i32
    %c0_i32_1 = arith.constant 0 : i32
    return %c0_i32, %c0_i32_0 : i32, i32
  }
  func.func @transform_10(%arg0: i32) -> (i32, i32) {
    %c0_i32 = arith.constant 0 : i32
    %c0_i32_0 = arith.constant 0 : i32
    %c0_i32_1 = arith.constant 0 : i32
    return %c0_i32, %c0_i32_0 : i32, i32
  }
  func.func @transform_11(%arg0: i32) -> (i32, i32) {
    %c0_i32 = arith.constant 0 : i32
    %c0_i32_0 = arith.constant 0 : i32
    %c0_i32_1 = arith.constant 0 : i32
    return %c0_i32, %c0_i32_0 : i32, i32
  }
  func.func @transform_12(%arg0: i32) -> (i32, i32) {
    %c0_i32 = arith.constant 0 : i32
    %c0_i32_0 = arith.constant 0 : i32
    %c0_i32_1 = arith.constant 0 : i32
    return %c0_i32, %c0_i32_0 : i32, i32
  }
  func.func @transform_13(%arg0: i32) -> (i32, i32) {
    %c0_i32 = arith.constant 0 : i32
    %c0_i32_0 = arith.constant 0 : i32
    return %arg0, %c0_i32 : i32, i32
  }
}

</mosaic_0001>

<bundles_post_ra>
// kernel: tpu_custom_call.1
= control target key start
LH: loop header
LB: loop body
LE: loop exit
PB: predicated region body
PF: predicated region fallthrough
CT: control target
= control target key end

     0   :  { %v640_v0 = vmov 0.0   ;;  %vm641_vm0 = vmmov 0   ;;  %vm60_vm1 = vcmask 523264   ;;  %vm134_vm2 = vcmask 261120   ;;  %s871_s2 = inlined_call_operand.vmem [shape: f32[64,32], index: 2, kind: input, shape index: {}]   ;;  %s872_s0 = inlined_call_operand.vmem [shape: f32[8,64], index: 0, kind: input, shape index: {}]   ;;  %s873_s3 = inlined_call_operand.vmem [shape: f32[1,32], index: 3, kind: input, shape index: {}]   ;;  %s874_s7 = inlined_call_operand.vmem [shape: f32[4,64], index: 7, kind: input, shape index: {}]   ;;  %s875_s1 = inlined_call_operand.vmem [shape: f32[8,4], index: 1, kind: input, shape index: {}]   ;;  %s876_s6 = inlined_call_operand.vmem [shape: f32[32,64], index: 6, kind: input, shape index: {}]   ;;  %s877_s4 = inlined_call_operand.vmem [shape: f32[1,32], index: 4, kind: input, shape index: {}]   ;;  %s878_s5 = inlined_call_operand.vmem [shape: f32[1,32], index: 5, kind: input, shape index: {}]   ;;  %s879_s9 = inlined_call_operand.vmem [shape: f32[64,64], index: 9, kind: input, shape index: {}]   ;;  %s880_s11 = inlined_call_operand.vmem [shape: f32[64,2], index: 11, kind: input, shape index: {}]   ;;  %s881_s8 = inlined_call_operand.vmem [shape: f32[1,64], index: 8, kind: input, shape index: {}]   ;;  %s882_s10 = inlined_call_operand.vmem [shape: f32[1,64], index: 10, kind: input, shape index: {}]   ;;  %s883_s12 = inlined_call_operand.vmem [shape: f32[1,2], index: 12, kind: input, shape index: {}]   ;;  %s884_s13 = inlined_call_operand.vmem [shape: f32[8,2], index: 13, kind: output, shape index: {}]  }
   0x1   :  { %561 = vmatprep.subr.mxu0 %v640_v0  ;;  %v52_v1 = vld [vmem:[%s871_s2 + $0x38] sm:$0xff]  ;;  %v51_v2 = vld [vmem:[%s871_s2 + $0x30] sm:$0xff]  ;;  %577 = vmatprep.mubr.msk.f32.mxu0 %vm641_vm0, %v640_v0  ;;  %v50_v3 = vld [vmem:[%s871_s2 + $0x28] sm:$0xff]  ;;  %vm176_vm3 = vcmask 1043456   ;;  %vm172_vm4 = vcmask 31744   ;;  %vm509_vm5 = vcmask 15360  }
   0x2   :  { %562 = vmatpush3.msra.mxu0 %v52_v1  ;;  %580 = vmatprep.subr.mxu1 %v640_v0  ;;  %v49_v4 = vld [vmem:[%s871_s2 + $0x20] sm:$0xff]  ;;  %v48_v5 = vld [vmem:[%s871_s2 + $0x18] sm:$0xff]  ;;  %v47_v6 = vld [vmem:[%s871_s2 + $0x10] sm:$0xff] }
   0x3   :  { %563 = vmatprep.subr.mxu0 %v640_v0  ;;  %582 = vmatprep.mubr.msk.f32.mxu1 %vm641_vm0, %v640_v0  ;;  %v46_v7 = vld [vmem:[%s871_s2 + $0x8] sm:$0xff]  ;;  %v45_v8 = vld [vmem:[%s871_s2] sm:$0xff]  ;;  %v169_v22 = vld [vmem:[%s876_s6 + $0x18] sm:$0xff] }
   0x4   :  { %564 = vmatpush3.msra.mxu0 %v51_v2  ;;  %v44_v9 = vld [vmem:[%s872_s0] sm:$0xff]  ;;  %v168_v23 = vld [vmem:[%s876_s6 + $0x10] sm:$0xff]  ;;  %v167_v24 = vld [vmem:[%s876_s6 + $0x8] sm:$0xff] }
   0x5   :  { %565 = vmatprep.subr.mxu0 %v640_v0  ;;  %v515_v10 = vld [vmem:[%s873_s3] ss:$0 sm:$0xff]  ;;  %v339_v35 = vld [vmem:[%s879_s9 + $0x38] sm:$0xff]  ;;  %v338_v37 = vld [vmem:[%s879_s9 + $0x30] sm:$0xff] }
   0x6   :  { %566 = vmatpush3.msra.mxu0 %v50_v3  ;;  %v171_v20 = vld [vmem:[%s874_s7] sm:$0xf]  ;;  %v337_v38 = vld [vmem:[%s879_s9 + $0x28] sm:$0xff]  ;;  %v335_v42 = vld [vmem:[%s879_s9 + $0x18] sm:$0xff] }
   0x7   :  { %567 = vmatprep.subr.mxu0 %v640_v0  ;;  %v170_v21 = vld [vmem:[%s875_s1] sm:$0xff]  ;;  %581 = vmatpush3.msk.msra.mxu1 %vm176_vm3, %v171_v20  ;;  %v334_v43 = vld [vmem:[%s879_s9 + $0x10] sm:$0xff]  ;;  %v333_v44 = vld [vmem:[%s879_s9 + $0x8] sm:$0xff] }
   0x8   :  { %568 = vmatpush3.msra.mxu0 %v49_v4  ;;  %583 = vmatmul.mubr.msk.f32.vlgmr.msra.gmra.mxu1 %vm172_vm4, %v170_v21  ;;  %v166_v25 = vld [vmem:[%s876_s6] sm:$0xff]  ;;  %v428_v46 = vld [vmem:[%s880_s11 + $0x38] sm:$0xff]  ;;  %v427_v47 = vld [vmem:[%s880_s11 + $0x30] sm:$0xff] }
   0x9   :  { %569 = vmatprep.subr.mxu0 %v640_v0  ;;  %585 = vmatprep.subr.mxu1 %v640_v0  ;;  %v517_v30 = vld [vmem:[%s877_s4] ss:$0 sm:$0xff]  ;;  %v426_v48 = vld [vmem:[%s880_s11 + $0x28] sm:$0xff]  ;;  %v424_v50 = vld [vmem:[%s880_s11 + $0x18] sm:$0xff] }
   0xa   :  { %570 = vmatpush3.msra.mxu0 %v48_v5  ;;  %586 = vmatpush3.msra.mxu1 %v169_v22  ;;  %v518_v32 = vld [vmem:[%s878_s5] ss:$0 sm:$0xff]  ;;  %v423_v57 = vld [vmem:[%s880_s11 + $0x10] sm:$0xff]  ;;  %v422_v58 = vld [vmem:[%s880_s11 + $0x8] sm:$0xff] }
   0xb   :  { %571 = vmatprep.subr.mxu0 %v640_v0  ;;  %593 = vmatprep.mubr.msk.f32.mxu1 %vm641_vm0, %v640_v0  ;;  %v336_v39 = vld [vmem:[%s879_s9 + $0x20] sm:$0xff] }
   0xc   :  { %572 = vmatpush3.msra.mxu0 %v47_v6  ;;  %587 = vmatprep.subr.mxu1 %v640_v0  ;;  %v332_v45 = vld [vmem:[%s879_s9] sm:$0xff] }
   0xd   :  { %573 = vmatprep.subr.mxu0 %v640_v0  ;;  %588 = vmatpush3.msra.mxu1 %v168_v23  ;;  %v425_v49 = vld [vmem:[%s880_s11 + $0x20] sm:$0xff] }
   0xe   :  { %574 = vmatpush3.msra.mxu0 %v46_v7  ;;  %589 = vmatprep.subr.mxu1 %v640_v0  ;;  %v522_v52 = vld [vmem:[%s881_s8] ss:$0 sm:$0xff] }
   0xf   :  { %575 = vmatprep.subr.mxu0 %v640_v0  ;;  %590 = vmatpush3.msra.mxu1 %v167_v24  ;;  %v421_v59 = vld [vmem:[%s880_s11] sm:$0xff] }
  0x10   :  { %576 = vmatpush3.msra.mxu0 %v45_v8  ;;  %591 = vmatprep.subr.mxu1 %v640_v0  ;;  %v523_v60 = vld [vmem:[%s882_s10] ss:$0 sm:$0xff] }
  0x11   :  { %578 = vmatmul.mubr.msk.f32.vlgmr.msra.gmra.mxu0 %vm60_vm1, %v44_v9  ;;  %615 = vmatprep.subr.mxu0 %v640_v0  ;;  %v525_v2 = vld [vmem:[%s883_s12] ss:$0 sm:$0xff] }
  0x12   :  { %631 = vmatprep.mubr.msk.f32.mxu0 %vm641_vm0, %v640_v0  ;;  %592 = vmatpush3.msra.mxu1 %v166_v25 }
  0x13   :  { %596 = vmatprep.subr.mxu1 %v640_v0  ;;  %616 = vmatpush3.msra.mxu0 %v428_v46 }
  0x14   :  { %617 = vmatprep.subr.mxu0 %v640_v0 }
  0x15   :  { %618 = vmatpush3.msra.mxu0 %v427_v47 }
  0x16   :  { %619 = vmatprep.subr.mxu0 %v640_v0 }
  0x17   :  { %620 = vmatpush3.msra.mxu0 %v426_v48 }
  0x18   :  { %621 = vmatprep.subr.mxu0 %v640_v0 }
  0x19   :  { %622 = vmatpush3.msra.mxu0 %v425_v49 }
  0x1a   :  { %623 = vmatprep.subr.mxu0 %v640_v0 }
  0x1b   :  { %624 = vmatpush3.msra.mxu0 %v424_v50 }
  0x1c   :  { %625 = vmatprep.subr.mxu0 %v640_v0 }
  0x1d   :  { %626 = vmatpush3.msra.mxu0 %v423_v57 }
  0x1e   :  { %627 = vmatprep.subr.mxu0 %v640_v0 }
  0x1f   :  { %628 = vmatpush3.msra.mxu0 %v422_v58 }
  0x20   :  { %629 = vmatprep.subr.mxu0 %v640_v0 }
  0x21   :  { %630 = vmatpush3.msra.mxu0 %v421_v59 }
  0xc8   :  { %v246_v40 = vpop.f32.mrf.mxu1 }
  0xca   :  { %v584_v41 = vpop.f32.mrf.mxu1 }
  0xd1   :  { %v130_v11 = vpop.f32.mrf.mxu0 }
  0xd2   :  { %v131_v12 = vadd.f32 %v515_v10, %v130_v11 }
  0xd3   :  { %v579_v13 = vpop.f32.mrf.mxu0 }
  0xd4   :  { %v135_v14 = vsel %vm134_vm2, %v131_v12, 0.0 }
  0xd5   :  { %136 = vadd.xlane.f32.xlu0 %v135_v14 }
 0x15e   :  { %v137_v15 = vpop.xlane.xlu0 %136 }
 0x15f   :  { %v139_v16 = vmul.f32 0.03125, %v137_v15 }
 0x161   :  { %v140_v17 = vsub.f32 %v131_v12, %v139_v16 }
 0x163   :  { %v141_v18 = vmul.f32 %v140_v17, %v140_v17 }
 0x165   :  { %v142_v19 = vsel %vm134_vm2, %v141_v18, 0.0 }
 0x166   :  { %143 = vadd.xlane.f32.xlu0 %v142_v19 }
 0x1ef   :  { %v144_v26 = vpop.xlane.xlu0 %143 }
 0x1f0   :  { %v145_v27 = vmul.f32 0.03125, %v144_v26 }
 0x1f2   :  { %v146_v28 = vadd.f32 1e-05, %v145_v27 }
 0x1f4   :  { %636 = vrsqrt.f32 %v146_v28 }
 0x201   :  { %v637_v29 = vpop.eup %636 }
 0x202   :  { %v148_v31 = vmul.f32 %v637_v29, %v140_v17 }
 0x204   :  { %v156_v33 = vmul.f32 %v517_v30, %v148_v31 }
 0x206   :  { %v164_v34 = vadd.f32 %v518_v32, %v156_v33 }
 0x208   :  { %638 = vtanh.f32 %v164_v34 }
 0x215   :  { %v639_v36 = vpop.eup %638 }
 0x216   :  { %594 = vmatmul.mubr.msk.f32.vlgmr.msra.gmra.mxu1 %vm134_vm2, %v639_v36 }
 0x217   :  { %597 = vmatpush3.msra.mxu1 %v339_v35  ;;  %612 = vmatprep.mubr.msk.f32.mxu1 %vm641_vm0, %v640_v0 }
 0x218   :  { %598 = vmatprep.subr.mxu1 %v640_v0 }
 0x219   :  { %599 = vmatpush3.msra.mxu1 %v338_v37 }
 0x21a   :  { %600 = vmatprep.subr.mxu1 %v640_v0 }
 0x21b   :  { %601 = vmatpush3.msra.mxu1 %v337_v38 }
 0x21c   :  { %602 = vmatprep.subr.mxu1 %v640_v0 }
 0x21d   :  { %603 = vmatpush3.msra.mxu1 %v336_v39 }
 0x21e   :  { %604 = vmatprep.subr.mxu1 %v640_v0 }
 0x21f   :  { %605 = vmatpush3.msra.mxu1 %v335_v42 }
 0x220   :  { %606 = vmatprep.subr.mxu1 %v640_v0 }
 0x221   :  { %607 = vmatpush3.msra.mxu1 %v334_v43 }
 0x222   :  { %608 = vmatprep.subr.mxu1 %v640_v0 }
 0x223   :  { %609 = vmatpush3.msra.mxu1 %v333_v44 }
 0x224   :  { %610 = vmatprep.subr.mxu1 %v640_v0 }
 0x225   :  { %611 = vmatpush3.msra.mxu1 %v332_v45 }
 0x2d6   :  { %v319_v51 = vpop.f32.mrf.mxu1 }
 0x2d7   :  { %v320_v53 = vadd.f32 %v319_v51, %v246_v40 }
 0x2d8   :  { %v595_v54 = vpop.f32.mrf.mxu1 }
 0x2d9   :  { %v330_v55 = vadd.f32 %v522_v52, %v320_v53 }
 0x2db   :  { %v331_v56 = vmax.f32 %v330_v55, 0.0 }
 0x2dd   :  { %613 = vmatmul.mubr.msk.f32.vlgmr.msra.gmra.mxu1 %vm60_vm1, %v331_v56 }
 0x39d   :  { %v416_v61 = vpop.f32.mrf.mxu1 }
 0x39e   :  { %v417_v62 = vadd.f32 %v523_v60, %v416_v61 }
 0x39f   :  { %v614_v63 = vpop.f32.mrf.mxu1 }
 0x3a0   :  { %v420_v1 = vmax.f32 %v417_v62, 0.0 }
 0x3a2   :  { %632 = vmatmul.mubr.msk.f32.vlgmr.msra.gmra.mxu0 %vm60_vm1, %v420_v1 }
 0x462   :  { %v505_v0 = vpop.f32.mrf.mxu0 }
 0x463   :  { %v506_v3 = vadd.f32 %v525_v2, %v505_v0 }
 0x464   :  { %v633_v4 = vpop.f32.mrf.mxu0 }
 0x465   :  { %510 = vst.msk [vmem:[%s884_s13] sm:$0xff] %vm509_vm5, %v506_v3 }

</bundles_post_ra>
